<compile_context>
chip_gen: v7x
topology: tpu7x:2x2x1
jax: 0.10.0
libtpu: 0.0.40
codegen_flags: <defaults>
</compile_context>

<pallas_src>
import jax
import jax.numpy as jnp
from jax import lax
from jax.experimental import pallas as pl
from jax.experimental.pallas import tpu as pltpu


# ---------------------------------------------------------------------------
# Single-step kernel (two resident dots + fused heads; no wrapper-side concat).
# ---------------------------------------------------------------------------
def _rnet_step_kernel(x_ref, h_ref, wi_ref, wh_ref, brec_ref, whead_ref, bhead_ref,
                      hact_ref, head_ref):
    cdt = wi_ref.dtype
    pre = (jnp.dot(x_ref[...].astype(cdt), wi_ref[...],
                   preferred_element_type=jnp.float32)
           + jnp.dot(h_ref[...].astype(cdt), wh_ref[...],
                     preferred_element_type=jnp.float32)
           + brec_ref[...])
    hact = jnp.tanh(pre)                                   # f32
    hact_ref[...] = hact
    head_ref[...] = (jnp.dot(hact.astype(whead_ref.dtype), whead_ref[...],
                             preferred_element_type=jnp.float32)
                     + bhead_ref[...])


# ---------------------------------------------------------------------------
# Whole-rollout kernel: T timesteps inside ONE pallas_call, no grid.
#   prologue : xproj = xs_flat @ Wi + b          (one batched matmul, M = T*B)
#   loop     : h = tanh(xproj[t*B:(t+1)*B] + h @ W)   (unrolled fori_loop)
#   epilogue : heads = hact_all @ [Wo|Wv] + [bo|bv]   (one batched matmul)
# ---------------------------------------------------------------------------
def _rnet_rollout_kernel(xs_ref, h0_ref, wi_ref, wh_ref, brec_ref,
                         whead_ref, bhead_ref,
                         hact_ref, head_ref, xproj_scr):
    B = h0_ref.shape[0]
    T = xs_ref.shape[0] // B
    cdt = wi_ref.dtype

    # -- prologue: input projection for ALL timesteps (independent of recurrence)
    xproj_scr[...] = (jnp.dot(xs_ref[...].astype(cdt), wi_ref[...],
                              preferred_element_type=jnp.float32)
                      + brec_ref[...])

    wh = wh_ref[...]                                       # hoisted out of the loop

    def step(t, h):                                        # h carried in f32
        start = t * B
        pre = xproj_scr[pl.ds(start, B), :] + jnp.dot(
            h.astype(cdt), wh, preferred_element_type=jnp.float32)
        hact = jnp.tanh(pre)
        hact_ref[pl.ds(start, B), :] = hact
        return hact

    lax.fori_loop(0, T, step, h0_ref[...], unroll=True)

    # -- epilogue: fused action/value heads for all timesteps in one matmul
    head_ref[...] = (jnp.dot(hact_ref[...].astype(whead_ref.dtype), whead_ref[...],
                             preferred_element_type=jnp.float32)
                     + bhead_ref[...])


# ---------------------------------------------------------------------------
# Parameter handling.
# ---------------------------------------------------------------------------
def init_params(key, isize, hsize, num_actions):
    """Deterministic init mirroring the PyTorch module's parameter shapes."""
    k = jax.random.split(key, 7)
    lim_i = 1.0 / jnp.sqrt(isize)
    lim_h = 1.0 / jnp.sqrt(hsize)
    return {
        "i2h_w": jax.random.uniform(k[0], (hsize, isize), jnp.float32, -lim_i, lim_i),
        "i2h_b": jax.random.uniform(k[1], (hsize,), jnp.float32, -lim_i, lim_i),
        "w": 0.001 * jax.random.uniform(k[2], (hsize, hsize), jnp.float32),
        "h2o_w": jax.random.uniform(k[3], (num_actions, hsize), jnp.float32, -lim_h, lim_h),
        "h2o_b": jax.random.uniform(k[4], (num_actions,), jnp.float32, -lim_h, lim_h),
        "h2v_w": jax.random.uniform(k[5], (1, hsize), jnp.float32, -lim_h, lim_h),
        "h2v_b": jax.random.uniform(k[6], (1,), jnp.float32, -lim_h, lim_h),
    }


def prepare_fused_params(params, compute_dtype=jnp.bfloat16):
    """One-time (init) repack of PyTorch-layout params into kernel layout.

    Weights fed to the MXU are stored in `compute_dtype` (bf16 by default, native
    on v6e/v7x and fine on v5e); biases, accumulation, tanh and the recurrent h
    carry stay f32.  Nothing layout-related is emitted per forward step.
    In real configs, pad hsize (and isize) to multiples of 128 here, not per step.
    """
    wi = params["i2h_w"].T                                 # [isize, H]
    wh = params["w"]                                       # [H, H]
    wo = params["h2o_w"].T                                 # [H, na]
    wv = params["h2v_w"].T                                 # [H, 1]
    return {
        "w_in": wi.astype(compute_dtype),
        "w_hh": wh.astype(compute_dtype),
        "w_head": jnp.concatenate([wo, wv], axis=1).astype(compute_dtype),
        "b_rec": params["i2h_b"][None, :].astype(jnp.float32),       # [1, H]
        "b_head": jnp.concatenate([params["h2o_b"],
                                   params["h2v_b"]])[None, :].astype(jnp.float32),
        "isize": wi.shape[0],
        "hsize": wh.shape[0],
        "num_actions": wo.shape[1],
    }


# ---------------------------------------------------------------------------
# Single-step forward (matches the PyTorch module's forward()).
# ---------------------------------------------------------------------------
def standard_rnetwork_forward(inputs, hidden, fused):
    """inputs: [B, isize] f32; hidden: (h [B,H], hebb [B,H,H]) or None."""
    B, _ = inputs.shape
    hsize = fused["hsize"]
    na = fused["num_actions"]

    if hidden is None:
        h_prev = jnp.zeros((B, hsize), jnp.float32)
        hebb = jnp.zeros((B, hsize, hsize), jnp.float32)
    else:
        h_prev, hebb = hidden

    vmem = pl.BlockSpec(memory_space=pltpu.MemorySpace.VMEM)
    hactiv, head = pl.pallas_call(
        _rnet_step_kernel,
        out_shape=(jax.ShapeDtypeStruct((B, hsize), jnp.float32),
                   jax.ShapeDtypeStruct((B, na + 1), jnp.float32)),
        in_specs=[vmem] * 7,
        out_specs=(vmem, vmem),
    )(inputs, h_prev, fused["w_in"], fused["w_hh"],
      fused["b_rec"], fused["w_head"], fused["b_head"])

    activout = head[:, :na]
    valueout = head[:, na:]
    # TODO(synk): continuous_actions branch (softplus std head) not instantiated
    # since the module defaults to continuous_actions=False.
    return activout, valueout, (hactiv, hebb)


# ---------------------------------------------------------------------------
# Multi-step rollout: T forward steps amortized in ONE pallas_call (no grid).
# For RL env loops, prefer this path over calling the single-step kernel per step.
# ---------------------------------------------------------------------------
def standard_rnetwork_rollout(xs, hidden, fused):
    """xs: [T, B, isize] f32; hidden: (h0 [B,H], hebb [B,H,H]) or None."""
    T, B, isize = xs.shape
    hsize = fused["hsize"]
    na = fused["num_actions"]

    if hidden is None:
        h0 = jnp.zeros((B, hsize), jnp.float32)
        hebb = jnp.zeros((B, hsize, hsize), jnp.float32)
    else:
        h0, hebb = hidden

    vmem = pl.BlockSpec(memory_space=pltpu.MemorySpace.VMEM)
    # Outputs are kept [T*B, ...] (sublane-major flat) so the kernel can do the
    # batched head matmul and single stores; the reshape back here is free.
    hact_flat, head_flat = pl.pallas_call(
        _rnet_rollout_kernel,
        out_shape=(jax.ShapeDtypeStruct((T * B, hsize), jnp.float32),
                   jax.ShapeDtypeStruct((T * B, na + 1), jnp.float32)),
        in_specs=[vmem] * 7,
        out_specs=(vmem, vmem),
        scratch_shapes=[pltpu.VMEM((T * B, hsize), jnp.float32)],   # xproj
    )(xs.reshape(T * B, isize), h0, fused["w_in"], fused["w_hh"],
      fused["b_rec"], fused["w_head"], fused["b_head"])

    hacts = hact_flat.reshape(T, B, hsize)
    heads = head_flat.reshape(T, B, na + 1)
    # TODO(synk): for very long T / large hsize, chunk the time axis across a
    # sequential grid instead of keeping the whole rollout VMEM-resident.
    return heads[..., :na], heads[..., na:], (hacts[-1], hebb)


if __name__ == "__main__":
    B, ISIZE, HSIZE, NUM_ACTIONS, T = 8, 16, 32, 4, 8

    key = jax.random.PRNGKey(0)
    kp, kx, kh, ks = jax.random.split(key, 4)
    params = init_params(kp, ISIZE, HSIZE, NUM_ACTIONS)

    x = jax.random.normal(kx, (B, ISIZE), jnp.float32)
    h0 = jax.random.normal(kh, (B, HSIZE), jnp.float32)
    hebb0 = jnp.zeros((B, HSIZE, HSIZE), jnp.float32)
    xs = jax.random.normal(ks, (T, B, ISIZE), jnp.float32)

    # --- pure-JAX f32 references --------------------------------------------
    pre_ref = x @ params["i2h_w"].T + params["i2h_b"] + h0 @ params["w"]
    hact_ref = jnp.tanh(pre_ref)
    act_ref = hact_ref @ params["h2o_w"].T + params["h2o_b"]
    val_ref = hact_ref @ params["h2v_w"].T + params["h2v_b"]

    h = h0
    acts_ref, vals_ref = [], []
    for t in range(T):
        h = jnp.tanh(xs[t] @ params["i2h_w"].T + params["i2h_b"] + h @ params["w"])
        acts_ref.append(h @ params["h2o_w"].T + params["h2o_b"])
        vals_ref.append(h @ params["h2v_w"].T + params["h2v_b"])
    h_last_ref = h

    # f32 params -> exact check; bf16 params (v6e/v7x MXU path) -> loose check.
    for compute_dtype, atol in ((jnp.float32, 1e-5), (jnp.bfloat16, 1e-1)):
        fused = prepare_fused_params(params, compute_dtype)   # one-time repack

        # --- single-step forward (the module's forward) ----------------------
        activout, valueout, (hactiv, hebb) = standard_rnetwork_forward(
            x, (h0, hebb0), fused)
        jax.block_until_ready((activout, valueout, hactiv, hebb))
        assert jnp.allclose(hactiv, hact_ref, atol=atol)
        assert jnp.allclose(activout, act_ref, atol=atol)
        assert jnp.allclose(valueout, val_ref, atol=atol)

        # --- whole rollout: T steps inside ONE pallas_call --------------------
        acts_r, vals_r, (h_last, _) = standard_rnetwork_rollout(
            xs, (h0, hebb0), fused)
        jax.block_until_ready((acts_r, vals_r, h_last))
        for t in range(T):
            assert jnp.allclose(acts_r[t], acts_ref[t], atol=atol)
            assert jnp.allclose(vals_r[t], vals_ref[t], atol=atol)
        assert jnp.allclose(h_last, h_last_ref, atol=atol)

    print("KERNEL_OK")
</pallas_src>

<mosaic_0001>
module attributes {stable_mosaic.version = 11 : i64} {
  func.func @_rnet_step_kernel(%arg0: memref<8x16xf32, #tpu.memory_space<vmem>>, %arg1: memref<8x32xf32, #tpu.memory_space<vmem>>, %arg2: memref<16x32xf32, #tpu.memory_space<vmem>>, %arg3: memref<32x32xf32, #tpu.memory_space<vmem>>, %arg4: memref<1x32xf32, #tpu.memory_space<vmem>>, %arg5: memref<32x5xf32, #tpu.memory_space<vmem>>, %arg6: memref<1x5xf32, #tpu.memory_space<vmem>>, %arg7: memref<8x32xf32, #tpu.memory_space<vmem>>, %arg8: memref<8x5xf32, #tpu.memory_space<vmem>>) attributes {dimension_semantics = [], scalar_prefetch = 0 : i64, scratch_operands = 0 : i64, tpu.core_type = #tpu.core_type<tc>} {
    %c0 = arith.constant 0 : index
    %c0_0 = arith.constant 0 : index
    %0 = vector.load %arg0[%c0, %c0_0] : memref<8x16xf32, #tpu.memory_space<vmem>>, vector<8x16xf32>
    %c0_1 = arith.constant 0 : index
    %c0_2 = arith.constant 0 : index
    %1 = vector.load %arg2[%c0_1, %c0_2] : memref<16x32xf32, #tpu.memory_space<vmem>>, vector<16x32xf32>
    %cst = arith.constant dense<0.000000e+00> : vector<8x32xf32>
    %2 = tpu.matmul %0, %1, %cst {dimension_numbers = #tpu.dot_dimension_numbers<[1], [0], [0], [1], [0, 0, 1, 1], [], []>} : vector<8x16xf32>, vector<16x32xf32>, vector<8x32xf32> -> vector<8x32xf32>
    %c0_3 = arith.constant 0 : index
    %c0_4 = arith.constant 0 : index
    %3 = vector.load %arg1[%c0_3, %c0_4] : memref<8x32xf32, #tpu.memory_space<vmem>>, vector<8x32xf32>
    %c0_5 = arith.constant 0 : index
    %c0_6 = arith.constant 0 : index
    %4 = vector.load %arg3[%c0_5, %c0_6] : memref<32x32xf32, #tpu.memory_space<vmem>>, vector<32x32xf32>
    %cst_7 = arith.constant dense<0.000000e+00> : vector<8x32xf32>
    %5 = tpu.matmul %3, %4, %cst_7 {dimension_numbers = #tpu.dot_dimension_numbers<[1], [0], [0], [1], [0, 0, 1, 1], [], []>} : vector<8x32xf32>, vector<32x32xf32>, vector<8x32xf32> -> vector<8x32xf32>
    %6 = arith.addf %2, %5 : vector<8x32xf32>
    %c0_8 = arith.constant 0 : index
    %c0_9 = arith.constant 0 : index
    %7 = vector.load %arg4[%c0_8, %c0_9] : memref<1x32xf32, #tpu.memory_space<vmem>>, vector<1x32xf32>
    %8 = vector.broadcast %7 : vector<1x32xf32> to vector<8x32xf32>
    %9 = arith.addf %6, %8 : vector<8x32xf32>
    %10 = math.tanh %9 : vector<8x32xf32>
    %c0_10 = arith.constant 0 : index
    %c0_11 = arith.constant 0 : index
    %11 = vector.load %arg7[%c0_10, %c0_11] : memref<8x32xf32, #tpu.memory_space<vmem>>, vector<8x32xf32>
    tpu.vector_store %arg7[%c0_10, %c0_11], %10 {strides = array<i32>} : memref<8x32xf32, #tpu.memory_space<vmem>>, vector<8x32xf32>,
    %c0_12 = arith.constant 0 : index
    %c0_13 = arith.constant 0 : index
    %12 = vector.load %arg5[%c0_12, %c0_13] : memref<32x5xf32, #tpu.memory_space<vmem>>, vector<32x5xf32>
    %cst_14 = arith.constant dense<0.000000e+00> : vector<8x5xf32>
    %13 = tpu.matmul %10, %12, %cst_14 {dimension_numbers = #tpu.dot_dimension_numbers<[1], [0], [0], [1], [0, 0, 1, 1], [], []>} : vector<8x32xf32>, vector<32x5xf32>, vector<8x5xf32> -> vector<8x5xf32>
    %c0_15 = arith.constant 0 : index
    %c0_16 = arith.constant 0 : index
    %14 = vector.load %arg6[%c0_15, %c0_16] : memref<1x5xf32, #tpu.memory_space<vmem>>, vector<1x5xf32>
    %15 = vector.broadcast %14 : vector<1x5xf32> to vector<8x5xf32>
    %16 = arith.addf %13, %15 : vector<8x5xf32>
    %c0_17 = arith.constant 0 : index
    %c0_18 = arith.constant 0 : index
    %17 = vector.load %arg8[%c0_17, %c0_18] : memref<8x5xf32, #tpu.memory_space<vmem>>, vector<8x5xf32>
    tpu.vector_store %arg8[%c0_17, %c0_18], %16 {strides = array<i32>} : memref<8x5xf32, #tpu.memory_space<vmem>>, vector<8x5xf32>,
    return
  }
}

</mosaic_0001>

<bundles_post_ra>
// kernel: tpu_custom_call.1
= control target key start
LH: loop header
LB: loop body
LE: loop exit
PB: predicated region body
PF: predicated region fallthrough
CT: control target
= control target key end

     0   :  { %14 = vsyncpa [#allocation3], 0  ;;  %s645_s0 = inlined_call_operand.hbm [shape: f32[8,16], index: 0, kind: input, shape index: {}]   ;;  %s646_s1 = inlined_call_operand.hbm [shape: f32[8,32], index: 1, kind: input, shape index: {}]   ;;  %s647_s2 = inlined_call_operand.vmem [shape: f32[16,32], index: 2, kind: input, shape index: {}]   ;;  %s648_s3 = inlined_call_operand.vmem [shape: f32[32,32], index: 3, kind: input, shape index: {}]   ;;  %s649_s4 = inlined_call_operand.vmem [shape: f32[1,32], index: 4, kind: input, shape index: {}]   ;;  %s650_s5 = inlined_call_operand.vmem [shape: f32[32,5], index: 5, kind: input, shape index: {}]   ;;  %s651_s6 = inlined_call_operand.vmem [shape: f32[1,5], index: 6, kind: input, shape index: {}]   ;;  %s652_s7 = inlined_call_operand.hbm [shape: f32[8,32], index: 7, kind: output, shape index: {0}]   ;;  %s653_s8 = inlined_call_operand.hbm [shape: f32[8,5], index: 8, kind: output, shape index: {1}]  }
   0x1   :  { %15 = vsyncpa [#allocation6], 0 }
   0x2   :  { %16 = vsyncpa [#allocation4], 0 }
   0x3   :  { %17 = vsyncpa [#allocation9], 0  ;;  %s503_s27 = smov [#allocation2]   ;;  %s504_s29 = smov [#allocation5]  }
   0x4   :  { %s24_s28 = sshll.u32 %s503_s27, 4  ;;  %s34_s30 = sshll.u32 %s504_s29, 4  ;;  %s25_s28 = int_to_ptr.vmem [resolvable:$true] %s24_s28  ;;  %s35_s30 = int_to_ptr.vmem [resolvable:$true] %s34_s30 }
   0x5   :  { %s407_s11 = scalar_lea.hbm %s645_s0, 128 }
   0x6   :  { %p408_p0 = scmp.ne.s32.totalorder %s645_s0, %s407_s11  ;;  %p411_p1 = scmp.lt.u32.totalorder %s407_s11, %s645_s0 }
   0x8   :  { %p413_p2 = pnand %p411_p1, %p408_p0 }
   0xa   :  { %416 = shalt.err (!%p413_p2)
}
   0xb   :  { %s417_s16 = scalar_lea.vmem %s25_s28, 128  ;;  %p422_p4 = scmp.lt.s32.totalorder %s25_s28, %s25_s28 }
   0xc   :  { %p418_p3 = scmp.ne.s32.totalorder %s25_s28, %s417_s16  ;;  %p423_p5 = scmp.lt.s32.totalorder %s417_s16, %s417_s16 }
   0xe   :  { %p424_p6 = por %p423_p5, %p422_p4 }
  0x10   :  { %p425_p7 = pnand %p424_p6, %p418_p3 }
  0x12   :  { %428 = shalt.err (!%p425_p7)
}
  0x13   :  { %27 = dma.hbm_to_vmem [thread:$0]  %s645_s0, 128, %s25_s28, [#allocation3]  }
  0x14   :  { %s429_s21 = scalar_lea.hbm %s646_s1, 128 }
  0x15   :  { %p430_p8 = scmp.ne.s32.totalorder %s646_s1, %s429_s21  ;;  %p433_p9 = scmp.lt.u32.totalorder %s429_s21, %s646_s1 }
  0x17   :  { %p435_p10 = pnand %p433_p9, %p430_p8 }
  0x19   :  { %438 = shalt.err (!%p435_p10)
}
  0x1a   :  { %s439_s26 = scalar_lea.vmem %s35_s30, 128  ;;  %p444_p12 = scmp.lt.s32.totalorder %s35_s30, %s35_s30 }
  0x1b   :  { %p440_p11 = scmp.ne.s32.totalorder %s35_s30, %s439_s26  ;;  %p445_p13 = scmp.lt.s32.totalorder %s439_s26, %s439_s26 }
  0x1d   :  { %p446_p0 = por %p445_p13, %p444_p12 }
  0x1f   :  { %p447_p1 = pnand %p446_p0, %p440_p11 }
  0x21   :  { %450 = shalt.err (!%p447_p1)
}
  0x22   :  { %37 = dma.hbm_to_vmem [thread:$0]  %s646_s1, 128, %s35_s30, [#allocation6]  }
  0x23   :  { %495 = dma.done.wait [#allocation3], 128  }
  0x24   :  { %496 = vsyncadd [#allocation3], 4294967168 }
  0x25   :  { %497 = dma.done.wait [#allocation6], 128  }
  0x26   :  { %498 = vsyncadd [#allocation6], 4294967168  ;;  %v505_v0 = vmov 0.0|0.0   ;;  %vm506_vm0 = vmmov 0   ;;  %v507_v1 = vmov 0.0   ;;  %v58_v2 = vld [vmem:[%s648_s3] sm:$0xff] }
  0x27   :  { %383 = vmatprep.subr.bf16.mxu0 %v505_v0  ;;  %389 = vmatprep.subr.bf16.mxu1 %v505_v0  ;;  %v59_v3 = vld [vmem:[%s648_s3 + $0x8] sm:$0xff]  ;;  %v55_v4 = vld [vmem:[%s647_s2] sm:$0xff]  ;;  %v60_v7 = vld [vmem:[%s648_s3 + $0x10] sm:$0xff]  ;;  %vm136_vm1 = vcmask 130048   ;;  %vm62_vm2 = vcmask 261120   ;;  %s508_s25 = smov [#allocation7]  }
  0x28   :  { %369 = vmatprep.mubr.msk.f32.mxu1 %vm506_vm0, %v507_v1  ;;  %362 = vmatprep.mubr.msk.f32.mxu0 %vm506_vm0, %v507_v1  ;;  %v384_v5 = vpack.c.bf16 %v59_v3, %v58_v2  ;;  %v56_v6 = vld [vmem:[%s647_s2 + $0x8] sm:$0xff]  ;;  %v61_v8 = vld [vmem:[%s648_s3 + $0x18] sm:$0xff]  ;;  %v54_v11 = vld [vmem:[#allocation2] sm:$0xff] }
  0x29   :  { %v390_v9 = vpack.c.bf16 %v56_v6, %v55_v4  ;;  %v387_v10 = vpack.c.bf16 %v61_v8, %v60_v7  ;;  %v57_v12 = vld [vmem:[#allocation5] sm:$0xff]  ;;  %v220_v13 = vld [vmem:[%s650_s5] sm:$0xff]  ;;  %v222_v16 = vld [vmem:[%s650_s5 + $0x10] sm:$0xff] }
  0x2a   :  { %385 = vmatpush3.bf16.msra.mxu0 %v384_v5  ;;  %v221_v14 = vld [vmem:[%s650_s5 + $0x8] sm:$0xff]  ;;  %v223_v17 = vld [vmem:[%s650_s5 + $0x18] sm:$0xff]  ;;  %v338_v22 = vld [vmem:[%s649_s4] ss:$0 sm:$0xff]  ;;  %s312_s5 = sshll.u32 %s508_s25, 4  ;;  %s313_s5 = int_to_ptr.vmem [resolvable:$true] %s312_s5 }
  0x2b   :  { %386 = vmatprep.subr.bf16.mxu0 %v505_v0  ;;  %391 = vmatpush3.bf16.msra.mxu1 %v390_v9  ;;  %v393_v15 = vpack.c.bf16 %v221_v14, %v220_v13  ;;  %v396_v18 = vpack.c.bf16 %v223_v17, %v222_v16  ;;  %s451_s26 = scalar_lea.vmem %s313_s5, 128  ;;  %p456_p3 = scmp.lt.s32.totalorder %s313_s5, %s313_s5 }
  0x2c   :  { %392 = vmatprep.subr.bf16.mxu1 %v505_v0  ;;  %p452_p2 = scmp.ne.s32.totalorder %s313_s5, %s451_s26  ;;  %p457_p4 = scmp.lt.s32.totalorder %s451_s26, %s451_s26 }
  0x2e   :  { %388 = vmatpush3.bf16.msra.mxu0 %v387_v10  ;;  %370 = vmatmul.mubr.msk.f32.vlgmr.msra.gmra.mrb[0].mxu1 %vm136_vm1, %v54_v11  ;;  %p458_p5 = por %p457_p4, %p456_p3 }
  0x2f   :  { %380 = vmatprep.mubr.msk.f32.mxu1 %vm506_vm0, %v507_v1  ;;  %394 = vmatpush3.bf16.msra.mxu1 %v393_v15 }
  0x30   :  { %395 = vmatprep.subr.bf16.mxu1 %v505_v0  ;;  %p459_p6 = pnand %p458_p5, %p452_p2 }
  0x31   :  { %363 = vmatmul.mubr.msk.f32.vlgmr.msra.gmra.mrb[0].mxu0 %vm62_vm2, %v57_v12 }
  0x33   :  { %397 = vmatpush3.bf16.msra.mxu1 %v396_v18 }
 0x101   :  { %v206_v19 = vpop.f32.mrb[0].mxu1 }
 0x102   :  { %v371_v20 = vpop.f32.mrb[1].mxu1 }
 0x104   :  { %v132_v21 = vpop.f32.mrb[0].mxu0 }
 0x105   :  { %v207_v23 = vadd.f32 %v206_v19, %v132_v21  ;;  %v364_v24 = vpop.f32.mrb[1].mxu0 }
 0x107   :  { %v217_v25 = vadd.f32 %v338_v22, %v207_v23 }
 0x109   :  { %405 = vtanh.f32 %v217_v25 }
 0x113   :  { %v406_v26 = vpop.eup %405 }
 0x114   :  { %219 = vst.msk [vmem:[#allocation7] sm:$0xff] %vm62_vm2, %v406_v26  ;;  %381 = vmatmul.mubr.msk.f32.vlgmr.msra.gmra.mrb[2].mxu1 %vm62_vm2, %v406_v26 }
 0x115   :  { %462 = shalt.err (!%p459_p6)
}
 0x116   :  { %s463_s27 = scalar_lea.hbm %s652_s7, 128 }
 0x117   :  { %p464_p7 = scmp.ne.s32.totalorder %s652_s7, %s463_s27  ;;  %p467_p8 = scmp.lt.u32.totalorder %s463_s27, %s652_s7 }
 0x119   :  { %p469_p9 = pnand %p467_p8, %p464_p7 }
 0x11b   :  { %472 = shalt.err (!%p469_p9)
}
 0x11c   :  { %315 = dma.vmem_to_hbm [thread:$0]  %s313_s5, 128, %s652_s7, [#allocation4]   ;;  %v339_v27 = vld [vmem:[%s651_s6] ss:$0 sm:$0xff]  ;;  %vm304_vm3 = vcmask 39936  }
 0x11d   :  { %s509_s13 = smov [#allocation8]  }
 0x11e   :  { %s322_s14 = sshll.u32 %s509_s13, 4  ;;  %s323_s14 = int_to_ptr.vmem [resolvable:$true] %s322_s14 }
 0x11f   :  { %s473_s15 = scalar_lea.vmem %s323_s14, 128  ;;  %p478_p11 = scmp.lt.s32.totalorder %s323_s14, %s323_s14 }
 0x120   :  { %p474_p10 = scmp.ne.s32.totalorder %s323_s14, %s473_s15  ;;  %p479_p12 = scmp.lt.s32.totalorder %s473_s15, %s473_s15 }
 0x122   :  { %p480_p13 = por %p479_p12, %p478_p11 }
 0x124   :  { %p481_p0 = pnand %p480_p13, %p474_p10 }
 0x1e7   :  { %v300_v28 = vpop.f32.mrb[2].mxu1 }
 0x1e8   :  { %v301_v29 = vadd.f32 %v339_v27, %v300_v28  ;;  %v382_v30 = vpop.f32.mrb[3].mxu1 }
 0x1ea   :  { %305 = vst.msk [vmem:[#allocation8] sm:$0xff] %vm304_vm3, %v301_v29 }
 0x1eb   :  { %484 = shalt.err (!%p481_p0)
}
 0x1ec   :  { %s485_s2 = scalar_lea.hbm %s653_s8, 128 }
 0x1ed   :  { %p486_p1 = scmp.ne.s32.totalorder %s653_s8, %s485_s2  ;;  %p489_p2 = scmp.lt.u32.totalorder %s485_s2, %s653_s8 }
 0x1ef   :  { %p491_p3 = pnand %p489_p2, %p486_p1 }
 0x1f1   :  { %494 = shalt.err (!%p491_p3)
}
 0x1f2   :  { %325 = dma.vmem_to_hbm [thread:$0]  %s323_s14, 128, %s653_s8, [#allocation9]  }
 0x1f3   :  { %499 = dma.done.wait [#allocation4], 128  }
 0x1f4   :  { %500 = vsyncadd [#allocation4], 4294967168 }
 0x1f5   :  { %501 = dma.done.wait [#allocation9], 128  }
 0x1f6   :  { %502 = vsyncadd [#allocation9], 4294967168 }
 0x1f7   :  { %332 = vsyncpa [#allocation3], 1 }
 0x1f8   :  { %333 = vsyncpa [#allocation6], 1 }
 0x1f9   :  { %334 = vsyncpa [#allocation4], 1 }
 0x1fa   :  { %335 = vsyncpa [#allocation9], 1 }

</bundles_post_ra>
